<compile_context>
chip_gen: v5e
topology: v5e:2x2
jax: 0.10.0
libtpu: 0.0.40
codegen_flags: <defaults>
</compile_context>

<pallas_src>
import functools

import jax
import jax.numpy as jnp
from jax.experimental import pallas as pl
from jax.experimental.pallas import tpu as pltpu

BN_EPS = 1e-5
LANE = 128          # all feature dims are zero-padded to this lane width
N_LAYERS = 4        # 3 hidden Linear+BN+ReLU blocks + 1 output Linear


def _mlp_kernel(x_ref, w_ref, v_ref, o_ref):
    # x_ref: (B, D)        f32 -- raw input, NOT padded (padding is fused here)
    # w_ref: (4, 128, 128) f32 -- per-layer (in, out) weights, zero-padded
    # v_ref: (8, 128)      f32 -- rows [g1, be1, g2, be2, g3, be3, b_out, unused]
    # o_ref: (B, 128)      f32 -- lane-dense output slab (real features in [:dim])
    b, d = x_ref.shape
    inv_b = 1.0 / b                       # static Python float
    v = v_ref[...]                        # exactly one (8,128) vreg load

    def bn_relu(h, gamma, beta):
        # one data pass for both reductions, one fused scale/shift pass
        s = jnp.sum(h, axis=0, keepdims=True)
        ss = jnp.sum(h * h, axis=0, keepdims=True)
        mean = s * inv_b
        var = jnp.maximum(ss * inv_b - mean * mean, 0.0)   # biased var, clamped >= 0
        scale = gamma * jax.lax.rsqrt(var + BN_EPS)        # EUP rsqrt
        shift = beta - mean * scale
        return jnp.maximum(h * scale + shift, 0.0)         # ReLU

    # First matmul consumes the un-padded (B, d) input against the first d weight
    # rows; padded weight columns (and gamma) are zero, so padded lanes stay exactly
    # zero through every layer.
    h = jnp.dot(x_ref[...], w_ref[0, :d, :], preferred_element_type=jnp.float32)
    h = bn_relu(h, v[0:1, :], v[1:2, :])
    h = bn_relu(jnp.dot(h, w_ref[1], preferred_element_type=jnp.float32),
                v[2:3, :], v[3:4, :])
    h = bn_relu(jnp.dot(h, w_ref[2], preferred_element_type=jnp.float32),
                v[4:5, :], v[5:6, :])
    o_ref[...] = (jnp.dot(h, w_ref[3], preferred_element_type=jnp.float32)
                  + v[6:7, :])


@functools.partial(jax.jit, static_argnames=("dim",))
def time_invariant_velocity_net(t, x, w_slab, v_slab, *, dim):
    """Single forward pass, x: (B, dim).  `t` is ignored (time-invariant)."""
    del t
    B, _ = x.shape
    vmem = pl.BlockSpec(memory_space=pltpu.MemorySpace.VMEM)
    out = pl.pallas_call(
        _mlp_kernel,
        out_shape=jax.ShapeDtypeStruct((B, LANE), x.dtype),
        in_specs=[vmem, vmem, vmem],
        out_specs=vmem,
    )(x, w_slab, v_slab)
    return out[:, :dim]          # lane-dense slab in the kernel, slice outside


@functools.partial(jax.jit, static_argnames=("dim",))
def time_invariant_velocity_net_batched(t, xs, w_slab, v_slab, *, dim):
    """G independent forward passes fused into one pallas_call.

    xs: (G, B, dim).  Each group gets its own BatchNorm statistics, exactly as if
    the module were called G times (e.g. once per ODE-solver evaluation).  Weights
    stay VMEM-resident across the grid (index_map returns the same block); the grid
    axis is parallel so v7x uses both TensorCores.
    """
    del t
    G, B, D = xs.shape
    out = pl.pallas_call(
        _mlp_kernel,
        out_shape=jax.ShapeDtypeStruct((G, B, LANE), xs.dtype),
        grid_spec=pltpu.PrefetchScalarGridSpec(
            num_scalar_prefetch=0,
            grid=(G,),
            in_specs=[
                pl.BlockSpec((None, B, D), lambda g: (g, 0, 0)),            # per-group x
                pl.BlockSpec((N_LAYERS, LANE, LANE), lambda g: (0, 0, 0)),  # resident
                pl.BlockSpec((8, LANE), lambda g: (0, 0)),                  # resident
            ],
            out_specs=pl.BlockSpec((None, B, LANE), lambda g: (g, 0, 0)),
        ),
        compiler_params=pltpu.CompilerParams(
            dimension_semantics=("parallel",)),
        # NOTE: for very large B (whole-batch-per-block BN) raise vmem_limit_bytes
        # here; v7x has 64 MiB VMEM vs 128 MiB on v5e/v6e.
    )(xs, w_slab, v_slab)
    return out[..., :dim]


def init_params(key, dim, hidden_dims):
    """Deterministic synthetic parameters matching the module's shapes."""
    dims = [dim, *hidden_dims, dim]
    params = {"hidden": [], "out": None}
    keys = jax.random.split(key, len(dims) - 1)
    for i in range(len(dims) - 2):
        k_w, k_b = jax.random.split(keys[i])
        fan_in = dims[i]
        # Linear weight stored already transposed: (in, out)
        w = jax.random.uniform(k_w, (dims[i], dims[i + 1]), jnp.float32,
                               minval=-1.0, maxval=1.0) / jnp.sqrt(fan_in)
        b = jax.random.uniform(k_b, (1, dims[i + 1]), jnp.float32,
                               minval=-1.0, maxval=1.0) / jnp.sqrt(fan_in)
        gamma = jnp.ones((1, dims[i + 1]), jnp.float32)
        beta = jnp.zeros((1, dims[i + 1]), jnp.float32)
        params["hidden"].append((w, b, gamma, beta))
    k_w, k_b = jax.random.split(keys[-1])
    fan_in = dims[-2]
    w_out = jax.random.uniform(k_w, (dims[-2], dims[-1]), jnp.float32,
                               minval=-1.0, maxval=1.0) / jnp.sqrt(fan_in)
    b_out = jax.random.uniform(k_b, (1, dims[-1]), jnp.float32,
                               minval=-1.0, maxval=1.0) / jnp.sqrt(fan_in)
    params["out"] = (w_out, b_out)
    return params


def pack_params(params):
    """Pack all parameters into two lane-dense slabs (one-time, outside the kernel).

    Hidden-layer Linear biases are intentionally dropped: they are exactly cancelled
    by BatchNorm's mean subtraction under batch statistics (training-mode forward).
    """
    assert len(params["hidden"]) == N_LAYERS - 1
    w_slab = jnp.zeros((N_LAYERS, LANE, LANE), jnp.float32)
    v_slab = jnp.zeros((8, LANE), jnp.float32)
    for i, (w, _b, g, be) in enumerate(params["hidden"]):
        din, dout = w.shape
        assert din <= LANE and dout <= LANE  # TODO(synk): tile weights for dims > 128
        w_slab = w_slab.at[i, :din, :dout].set(w)
        v_slab = v_slab.at[2 * i, :dout].set(g[0])
        v_slab = v_slab.at[2 * i + 1, :dout].set(be[0])
    w_out, b_out = params["out"]
    din, dout = w_out.shape
    assert din <= LANE and dout <= LANE
    w_slab = w_slab.at[N_LAYERS - 1, :din, :dout].set(w_out)
    v_slab = v_slab.at[6, :dout].set(b_out[0])
    return w_slab, v_slab


def reference_forward(x, params):
    """Pure-JAX reference with the original semantics (hidden biases included)."""
    hi = jax.lax.Precision.HIGHEST
    h = x
    for (w, b, g, be) in params["hidden"]:
        h = jnp.dot(h, w, precision=hi) + b
        mean = jnp.mean(h, axis=0, keepdims=True)
        var = jnp.mean((h - mean) ** 2, axis=0, keepdims=True)
        h = (h - mean) * jax.lax.rsqrt(var + BN_EPS) * g + be
        h = jnp.maximum(h, 0.0)
    w, b = params["out"]
    return jnp.dot(h, w, precision=hi) + b


if __name__ == "__main__":
    key = jax.random.PRNGKey(0)
    k_param, k_x, k_xs = jax.random.split(key, 3)

    dim = 8                      # input_size == target_size == dim
    hidden_dims = [32, 32, 32]
    batch = 8                    # 8-aligned batch; BN statistics over the whole batch
    groups = 2                   # fused independent evaluations for the batched path

    params = init_params(k_param, dim, hidden_dims)
    w_slab, v_slab = pack_params(params)

    t = jnp.zeros((batch, 1), jnp.float32)   # ignored by the forward

    # --- single forward pass (matches module.forward(t, x)) ---
    x = jax.random.normal(k_x, (batch, dim), jnp.float32)
    out = time_invariant_velocity_net(t, x, w_slab, v_slab, dim=dim)
    out = jax.block_until_ready(out)
    ref = reference_forward(x, params)
    assert out.shape == (batch, dim)
    assert jnp.allclose(out, ref, atol=1e-4, rtol=1e-4), "single-call mismatch"

    # --- fused multi-evaluation path (one pallas_call, weights VMEM-resident) ---
    xs = jax.random.normal(k_xs, (groups, batch, dim), jnp.float32)
    outs = time_invariant_velocity_net_batched(t, xs, w_slab, v_slab, dim=dim)
    outs = jax.block_until_ready(outs)
    refs = jnp.stack([reference_forward(xs[g], params) for g in range(groups)])
    assert outs.shape == (groups, batch, dim)
    assert jnp.allclose(outs, refs, atol=1e-4, rtol=1e-4), "batched mismatch"

    print("KERNEL_OK")
</pallas_src>

<mosaic_0001>
module attributes {stable_mosaic.version = 11 : i64} {
  func.func @_mlp_kernel(%arg0: memref<8x8xf32, #tpu.memory_space<vmem>>, %arg1: memref<4x128x128xf32, #tpu.memory_space<vmem>>, %arg2: memref<8x128xf32, #tpu.memory_space<vmem>>, %arg3: memref<8x128xf32, #tpu.memory_space<vmem>>) attributes {dimension_semantics = [], scalar_prefetch = 0 : i64, scratch_operands = 0 : i64, tpu.core_type = #tpu.core_type<tc>} {
    %c0 = arith.constant 0 : index
    %c0_0 = arith.constant 0 : index
    %0 = vector.load %arg2[%c0, %c0_0] : memref<8x128xf32, #tpu.memory_space<vmem>>, vector<8x128xf32>
    %c0_1 = arith.constant 0 : index
    %c0_2 = arith.constant 0 : index
    %1 = vector.load %arg0[%c0_1, %c0_2] : memref<8x8xf32, #tpu.memory_space<vmem>>, vector<8x8xf32>
    %c0_3 = arith.constant 0 : index
    %c0_4 = arith.constant 0 : index
    %c0_5 = arith.constant 0 : index
    %2 = vector.load %arg1[%c0_3, %c0_4, %c0_5] : memref<4x128x128xf32, #tpu.memory_space<vmem>>, vector<1x8x128xf32>
    %3 = vector.shape_cast %2 : vector<1x8x128xf32> to vector<8x128xf32>
    %cst = arith.constant dense<0.000000e+00> : vector<8x128xf32>
    %4 = tpu.matmul %1, %3, %cst {dimension_numbers = #tpu.dot_dimension_numbers<[1], [0], [0], [1], [0, 0, 1, 1], [], []>} : vector<8x8xf32>, vector<8x128xf32>, vector<8x128xf32> -> vector<8x128xf32>
    %5 = vector.extract_strided_slice %0 {offsets = [0, 0], sizes = [1, 128], strides = [1, 1]} : vector<8x128xf32> to vector<1x128xf32>
    %6 = vector.extract_strided_slice %0 {offsets = [1, 0], sizes = [1, 128], strides = [1, 1]} : vector<8x128xf32> to vector<1x128xf32>
    %cst_6 = arith.constant dense<0.000000e+00> : vector<128xf32>
    %7 = vector.multi_reduction <add>, %4, %cst_6 [0] : vector<8x128xf32> to vector<128xf32>
    %8 = vector.shape_cast %7 : vector<128xf32> to vector<1x128xf32>
    %9 = arith.mulf %4, %4 : vector<8x128xf32>
    %cst_7 = arith.constant dense<0.000000e+00> : vector<128xf32>
    %10 = vector.multi_reduction <add>, %9, %cst_7 [0] : vector<8x128xf32> to vector<128xf32>
    %11 = vector.shape_cast %10 : vector<128xf32> to vector<1x128xf32>
    %cst_8 = arith.constant 1.250000e-01 : f32
    %12 = vector.broadcast %cst_8 : f32 to vector<1x128xf32>
    %13 = arith.mulf %8, %12 : vector<1x128xf32>
    %cst_9 = arith.constant 1.250000e-01 : f32
    %14 = vector.broadcast %cst_9 : f32 to vector<1x128xf32>
    %15 = arith.mulf %11, %14 : vector<1x128xf32>
    %16 = arith.mulf %13, %13 : vector<1x128xf32>
    %17 = arith.subf %15, %16 : vector<1x128xf32>
    %cst_10 = arith.constant 0.000000e+00 : f32
    %18 = vector.broadcast %cst_10 : f32 to vector<1x128xf32>
    %19 = arith.maximumf %17, %18 : vector<1x128xf32>
    %cst_11 = arith.constant 9.99999974E-6 : f32
    %20 = vector.broadcast %cst_11 : f32 to vector<1x128xf32>
    %21 = arith.addf %19, %20 : vector<1x128xf32>
    %22 = math.rsqrt %21 : vector<1x128xf32>
    %23 = arith.mulf %5, %22 : vector<1x128xf32>
    %24 = arith.mulf %13, %23 : vector<1x128xf32>
    %25 = arith.subf %6, %24 : vector<1x128xf32>
    %26 = vector.broadcast %23 : vector<1x128xf32> to vector<8x128xf32>
    %27 = arith.mulf %4, %26 : vector<8x128xf32>
    %28 = vector.broadcast %25 : vector<1x128xf32> to vector<8x128xf32>
    %29 = arith.addf %27, %28 : vector<8x128xf32>
    %cst_12 = arith.constant 0.000000e+00 : f32
    %30 = vector.broadcast %cst_12 : f32 to vector<8x128xf32>
    %31 = arith.maximumf %29, %30 : vector<8x128xf32>
    %c1 = arith.constant 1 : index
    %c0_13 = arith.constant 0 : index
    %c0_14 = arith.constant 0 : index
    %32 = vector.load %arg1[%c1, %c0_13, %c0_14] : memref<4x128x128xf32, #tpu.memory_space<vmem>>, vector<1x128x128xf32>
    %33 = vector.shape_cast %32 : vector<1x128x128xf32> to vector<128x128xf32>
    %cst_15 = arith.constant dense<0.000000e+00> : vector<8x128xf32>
    %34 = tpu.matmul %31, %33, %cst_15 {dimension_numbers = #tpu.dot_dimension_numbers<[1], [0], [0], [1], [0, 0, 1, 1], [], []>} : vector<8x128xf32>, vector<128x128xf32>, vector<8x128xf32> -> vector<8x128xf32>
    %35 = vector.extract_strided_slice %0 {offsets = [2, 0], sizes = [1, 128], strides = [1, 1]} : vector<8x128xf32> to vector<1x128xf32>
    %36 = vector.extract_strided_slice %0 {offsets = [3, 0], sizes = [1, 128], strides = [1, 1]} : vector<8x128xf32> to vector<1x128xf32>
    %cst_16 = arith.constant dense<0.000000e+00> : vector<128xf32>
    %37 = vector.multi_reduction <add>, %34, %cst_16 [0] : vector<8x128xf32> to vector<128xf32>
    %38 = vector.shape_cast %37 : vector<128xf32> to vector<1x128xf32>
    %39 = arith.mulf %34, %34 : vector<8x128xf32>
    %cst_17 = arith.constant dense<0.000000e+00> : vector<128xf32>
    %40 = vector.multi_reduction <add>, %39, %cst_17 [0] : vector<8x128xf32> to vector<128xf32>
    %41 = vector.shape_cast %40 : vector<128xf32> to vector<1x128xf32>
    %cst_18 = arith.constant 1.250000e-01 : f32
    %42 = vector.broadcast %cst_18 : f32 to vector<1x128xf32>
    %43 = arith.mulf %38, %42 : vector<1x128xf32>
    %cst_19 = arith.constant 1.250000e-01 : f32
    %44 = vector.broadcast %cst_19 : f32 to vector<1x128xf32>
    %45 = arith.mulf %41, %44 : vector<1x128xf32>
    %46 = arith.mulf %43, %43 : vector<1x128xf32>
    %47 = arith.subf %45, %46 : vector<1x128xf32>
    %cst_20 = arith.constant 0.000000e+00 : f32
    %48 = vector.broadcast %cst_20 : f32 to vector<1x128xf32>
    %49 = arith.maximumf %47, %48 : vector<1x128xf32>
    %cst_21 = arith.constant 9.99999974E-6 : f32
    %50 = vector.broadcast %cst_21 : f32 to vector<1x128xf32>
    %51 = arith.addf %49, %50 : vector<1x128xf32>
    %52 = math.rsqrt %51 : vector<1x128xf32>
    %53 = arith.mulf %35, %52 : vector<1x128xf32>
    %54 = arith.mulf %43, %53 : vector<1x128xf32>
    %55 = arith.subf %36, %54 : vector<1x128xf32>
    %56 = vector.broadcast %53 : vector<1x128xf32> to vector<8x128xf32>
    %57 = arith.mulf %34, %56 : vector<8x128xf32>
    %58 = vector.broadcast %55 : vector<1x128xf32> to vector<8x128xf32>
    %59 = arith.addf %57, %58 : vector<8x128xf32>
    %cst_22 = arith.constant 0.000000e+00 : f32
    %60 = vector.broadcast %cst_22 : f32 to vector<8x128xf32>
    %61 = arith.maximumf %59, %60 : vector<8x128xf32>
    %c2 = arith.constant 2 : index
    %c0_23 = arith.constant 0 : index
    %c0_24 = arith.constant 0 : index
    %62 = vector.load %arg1[%c2, %c0_23, %c0_24] : memref<4x128x128xf32, #tpu.memory_space<vmem>>, vector<1x128x128xf32>
    %63 = vector.shape_cast %62 : vector<1x128x128xf32> to vector<128x128xf32>
    %cst_25 = arith.constant dense<0.000000e+00> : vector<8x128xf32>
    %64 = tpu.matmul %61, %63, %cst_25 {dimension_numbers = #tpu.dot_dimension_numbers<[1], [0], [0], [1], [0, 0, 1, 1], [], []>} : vector<8x128xf32>, vector<128x128xf32>, vector<8x128xf32> -> vector<8x128xf32>
    %65 = vector.extract_strided_slice %0 {offsets = [4, 0], sizes = [1, 128], strides = [1, 1]} : vector<8x128xf32> to vector<1x128xf32>
    %66 = vector.extract_strided_slice %0 {offsets = [5, 0], sizes = [1, 128], strides = [1, 1]} : vector<8x128xf32> to vector<1x128xf32>
    %cst_26 = arith.constant dense<0.000000e+00> : vector<128xf32>
    %67 = vector.multi_reduction <add>, %64, %cst_26 [0] : vector<8x128xf32> to vector<128xf32>
    %68 = vector.shape_cast %67 : vector<128xf32> to vector<1x128xf32>
    %69 = arith.mulf %64, %64 : vector<8x128xf32>
    %cst_27 = arith.constant dense<0.000000e+00> : vector<128xf32>
    %70 = vector.multi_reduction <add>, %69, %cst_27 [0] : vector<8x128xf32> to vector<128xf32>
    %71 = vector.shape_cast %70 : vector<128xf32> to vector<1x128xf32>
    %cst_28 = arith.constant 1.250000e-01 : f32
    %72 = vector.broadcast %cst_28 : f32 to vector<1x128xf32>
    %73 = arith.mulf %68, %72 : vector<1x128xf32>
    %cst_29 = arith.constant 1.250000e-01 : f32
    %74 = vector.broadcast %cst_29 : f32 to vector<1x128xf32>
    %75 = arith.mulf %71, %74 : vector<1x128xf32>
    %76 = arith.mulf %73, %73 : vector<1x128xf32>
    %77 = arith.subf %75, %76 : vector<1x128xf32>
    %cst_30 = arith.constant 0.000000e+00 : f32
    %78 = vector.broadcast %cst_30 : f32 to vector<1x128xf32>
    %79 = arith.maximumf %77, %78 : vector<1x128xf32>
    %cst_31 = arith.constant 9.99999974E-6 : f32
    %80 = vector.broadcast %cst_31 : f32 to vector<1x128xf32>
    %81 = arith.addf %79, %80 : vector<1x128xf32>
    %82 = math.rsqrt %81 : vector<1x128xf32>
    %83 = arith.mulf %65, %82 : vector<1x128xf32>
    %84 = arith.mulf %73, %83 : vector<1x128xf32>
    %85 = arith.subf %66, %84 : vector<1x128xf32>
    %86 = vector.broadcast %83 : vector<1x128xf32> to vector<8x128xf32>
    %87 = arith.mulf %64, %86 : vector<8x128xf32>
    %88 = vector.broadcast %85 : vector<1x128xf32> to vector<8x128xf32>
    %89 = arith.addf %87, %88 : vector<8x128xf32>
    %cst_32 = arith.constant 0.000000e+00 : f32
    %90 = vector.broadcast %cst_32 : f32 to vector<8x128xf32>
    %91 = arith.maximumf %89, %90 : vector<8x128xf32>
    %c3 = arith.constant 3 : index
    %c0_33 = arith.constant 0 : index
    %c0_34 = arith.constant 0 : index
    %92 = vector.load %arg1[%c3, %c0_33, %c0_34] : memref<4x128x128xf32, #tpu.memory_space<vmem>>, vector<1x128x128xf32>
    %93 = vector.shape_cast %92 : vector<1x128x128xf32> to vector<128x128xf32>
    %cst_35 = arith.constant dense<0.000000e+00> : vector<8x128xf32>
    %94 = tpu.matmul %91, %93, %cst_35 {dimension_numbers = #tpu.dot_dimension_numbers<[1], [0], [0], [1], [0, 0, 1, 1], [], []>} : vector<8x128xf32>, vector<128x128xf32>, vector<8x128xf32> -> vector<8x128xf32>
    %95 = vector.extract_strided_slice %0 {offsets = [6, 0], sizes = [1, 128], strides = [1, 1]} : vector<8x128xf32> to vector<1x128xf32>
    %96 = vector.broadcast %95 : vector<1x128xf32> to vector<8x128xf32>
    %97 = arith.addf %94, %96 : vector<8x128xf32>
    %c0_36 = arith.constant 0 : index
    %c0_37 = arith.constant 0 : index
    %98 = vector.load %arg3[%c0_36, %c0_37] : memref<8x128xf32, #tpu.memory_space<vmem>>, vector<8x128xf32>
    tpu.vector_store %arg3[%c0_36, %c0_37], %97 {strides = array<i32>} : memref<8x128xf32, #tpu.memory_space<vmem>>, vector<8x128xf32>,
    return
  }
}

</mosaic_0001>

<bundles_post_ra>
// kernel: time_invariant_velocity_net.1
= control target key start
LH: loop header
LB: loop body
LE: loop exit
PB: predicated region body
PF: predicated region fallthrough
CT: control target
= control target key end

     0   :  { %8 = vsyncpa [#allocation3], 0  ;;  %s498_s0 = inlined_call_operand.hbm [shape: f32[8,8], index: 0, kind: input, shape index: {}]   ;;  %s499_s1 = inlined_call_operand.hbm [shape: f32[4,128,128], index: 1, kind: input, shape index: {}]   ;;  %s500_s2 = inlined_call_operand.hbm [shape: f32[8,128], index: 2, kind: input, shape index: {}]   ;;  %s501_s3 = inlined_call_operand.hbm [shape: f32[8,128], index: 3, kind: output, shape index: {}]  }
   0x1   :  { %9 = vsyncpa [#allocation6], 0  ;;  %s26_s14 = sshll.u32 %s499_s1, 4  ;;  %s27_s14 = int_to_ptr.hbm [resolvable:$true] %s26_s14 }
   0x2   :  { %10 = vsyncpa [#allocation4], 0  ;;  %s451_s15 = smov [#allocation5]   ;;  %s16_s19 = sshll.u32 %s498_s0, 4  ;;  %s17_s19 = int_to_ptr.hbm [resolvable:$true] %s16_s19 }
   0x3   :  { %s28_s16 = sshll.u32 %s451_s15, 4  ;;  %s452_s20 = smov 128   ;;  %s29_s16 = int_to_ptr.vmem [resolvable:$true] %s28_s16 }
   0x4   :  { %s453_s21 = smov 8   ;;  %s454_s22 = smov [#allocation2]  }
   0x5   :  { %34 = dma.hbm_to_vmem [thread:$0]  %s27_s14, 8192, %s29_s16, [#allocation6], %s452_s20, %s452_s20, %s453_s21  }
   0x6   :  { %s18_s23 = sshll.u32 %s454_s22, 4  ;;  %s40_s26 = sshll.u32 %s500_s2, 4  ;;  %s19_s23 = int_to_ptr.vmem [resolvable:$true] %s18_s23  ;;  %s41_s26 = int_to_ptr.hbm [resolvable:$true] %s40_s26 }
   0x7   :  { %21 = dma.hbm_to_vmem [thread:$0]  %s17_s19, 128, %s19_s23, [#allocation3]  }
   0x8   :  { %s455_s1 = smov [#allocation7]  }
   0x9   :  { %s42_s27 = sshll.u32 %s455_s1, 4  ;;  %s43_s27 = int_to_ptr.vmem [resolvable:$true] %s42_s27 }
   0xa   :  { %45 = dma.hbm_to_vmem [thread:$0]  %s41_s26, 128, %s43_s27, [#allocation6]  }
   0xb   :  { %445 = dma.done.wait [#allocation3], 128  }
   0xc   :  { %446 = vsyncadd [#allocation3], 4294967168 }
   0xd   :  { %447 = dma.done.wait [#allocation6], 8320  }
   0xe   :  { %448 = vsyncadd [#allocation6], 4294958976  ;;  %vm61_vm0 = vcmask 64512   ;;  %v60_v0 = vld [vmem:[#allocation5] sm:$0xff]  ;;  %v59_v1 = vld [vmem:[#allocation2] sm:$0xff]  ;;  %s456_s0 = smov [#allocation8]  }
   0xf   :  { %80 = vmatpush.msra.mxu0 %v60_v0  ;;  %v141_v2 = vld [vmem:[#allocation5 + $0xf8] sm:$0xff]  ;;  %v140_v3 = vld [vmem:[#allocation5 + $0xf0] sm:$0xff]  ;;  %v139_v4 = vld [vmem:[#allocation5 + $0xe8] sm:$0xff]  ;;  %s323_s2 = sshll.u32 %s456_s0, 4  ;;  %s325_s30 = sshll.u32 %s501_s3, 4  ;;  %s324_s2 = int_to_ptr.vmem [resolvable:$true] %s323_s2  ;;  %s326_s30 = int_to_ptr.hbm [resolvable:$true] %s325_s30 }
  0x10   :  { %336 = vmatmul.msk.f32.vlgmr.msra.gmra.mxu0 %vm61_vm0, %v59_v1  ;;  %142 = vmatpush.msra.mxu1 %v141_v2  ;;  %v138_v5 = vld [vmem:[#allocation5 + $0xe0] sm:$0xff]  ;;  %v137_v6 = vld [vmem:[#allocation5 + $0xd8] sm:$0xff]  ;;  %v136_v10 = vld [vmem:[#allocation5 + $0xd0] sm:$0xff] }
  0x11   :  { %v135_v13 = vld [vmem:[#allocation5 + $0xc8] sm:$0xff]  ;;  %v134_v16 = vld [vmem:[#allocation5 + $0xc0] sm:$0xff]  ;;  %v133_v19 = vld [vmem:[#allocation5 + $0xb8] sm:$0xff] }
  0x12   :  { %143 = vmatpush.msra.mxu1 %v140_v3  ;;  %v132_v22 = vld [vmem:[#allocation5 + $0xb0] sm:$0xff]  ;;  %v131_v25 = vld [vmem:[#allocation5 + $0xa8] sm:$0xff]  ;;  %v130_v28 = vld [vmem:[#allocation5 + $0xa0] sm:$0xff] }
  0x13   :  { %v129_v29 = vld [vmem:[#allocation5 + $0x98] sm:$0xff]  ;;  %v128_v32 = vld [vmem:[#allocation5 + $0x90] sm:$0xff]  ;;  %v127_v34 = vld [vmem:[#allocation5 + $0x88] sm:$0xff] }
  0x14   :  { %144 = vmatpush.msra.mxu1 %v139_v4  ;;  %v126_v36 = vld [vmem:[#allocation5 + $0x80] sm:$0xff]  ;;  %v218_v55 = vld [vmem:[#allocation5 + $0x178] sm:$0xff]  ;;  %v217_v56 = vld [vmem:[#allocation5 + $0x170] sm:$0xff] }
  0x15   :  { %v486_v43 = vld [vmem:[#allocation7] sm:$0xff]  ;;  %219 = vmatpush.msra.mxu2 %v218_v55  ;;  %v216_v57 = vld [vmem:[#allocation5 + $0x168] sm:$0xff]  ;;  %v214_v59 = vld [vmem:[#allocation5 + $0x158] sm:$0xff] }
  0x16   :  { %145 = vmatpush.msra.mxu1 %v138_v5  ;;  %v215_v58 = vld [vmem:[#allocation5 + $0x160] sm:$0xff]  ;;  %v213_v63 = vld [vmem:[#allocation5 + $0x150] sm:$0xff]  ;;  %v212_v2 = vld [vmem:[#allocation5 + $0x148] sm:$0xff] }
  0x17   :  { %220 = vmatpush.msra.mxu2 %v217_v56  ;;  %v211_v5 = vld [vmem:[#allocation5 + $0x140] sm:$0xff]  ;;  %v289_v55 = vld [vmem:[#allocation5 + $0x1c8] sm:$0xff] }
  0x18   :  { %146 = vmatpush.msra.mxu1 %v137_v6 }
  0x19   :  { %221 = vmatpush.msra.mxu2 %v216_v57 }
  0x1a   :  { %147 = vmatpush.msra.mxu1 %v136_v10 }
  0x1b   :  { %222 = vmatpush.msra.mxu2 %v215_v58  ;;  %v288_v58 = vld [vmem:[#allocation5 + $0x1c0] sm:$0xff] }
  0x1c   :  { %148 = vmatpush.msra.mxu1 %v135_v13 }
  0x1d   :  { %223 = vmatpush.msra.mxu2 %v214_v59 }
  0x1e   :  { %149 = vmatpush.msra.mxu1 %v134_v16 }
  0x1f   :  { %224 = vmatpush.msra.mxu2 %v213_v63 }
  0x20   :  { %150 = vmatpush.msra.mxu1 %v133_v19 }
  0x21   :  { %225 = vmatpush.msra.mxu2 %v212_v2 }
  0x22   :  { %151 = vmatpush.msra.mxu1 %v132_v22 }
  0x23   :  { %226 = vmatpush.msra.mxu2 %v211_v5 }
  0x24   :  { %152 = vmatpush.msra.mxu1 %v131_v25  ;;  %v203_v25 = vld [vmem:[#allocation5 + $0x100] sm:$0xff] }
  0x26   :  { %153 = vmatpush.msra.mxu1 %v130_v28 }
  0x28   :  { %154 = vmatpush.msra.mxu1 %v129_v29 }
  0x2a   :  { %155 = vmatpush.msra.mxu1 %v128_v32 }
  0x2c   :  { %156 = vmatpush.msra.mxu1 %v127_v34 }
  0x2e   :  { %157 = vmatpush.msra.mxu1 %v126_v36 }
  0x8d   :  { %v82_v7 = vpop.f32.mrf.mxu0 }
  0x8e   :  { %v85_v8 = vrot.slane %v82_v7, 4  ;;  %v91_v9 = vmul.f32 %v82_v7, %v82_v7 }
  0x90   :  { %v86_v11 = vadd.f32 %v85_v8, %v82_v7  ;;  %v92_v12 = vrot.slane %v91_v9, 4  ;;  %v210_v8 = vld [vmem:[#allocation5 + $0x138] sm:$0xff] }
  0x91   :  { %227 = vmatpush.msra.mxu2 %v210_v8 }
  0x92   :  { %v87_v14 = vrot.slane %v86_v11, 2  ;;  %v93_v15 = vadd.f32 %v92_v12, %v91_v9 }
  0x94   :  { %v88_v17 = vadd.f32 %v87_v14, %v86_v11  ;;  %v94_v18 = vrot.slane %v93_v15, 2  ;;  %v209_v11 = vld [vmem:[#allocation5 + $0x130] sm:$0xff]  ;;  %v208_v14 = vld [vmem:[#allocation5 + $0x128] sm:$0xff] }
  0x95   :  { %228 = vmatpush.msra.mxu2 %v209_v11 }
  0x96   :  { %v89_v20 = vrot.slane %v88_v17, 1  ;;  %v95_v21 = vadd.f32 %v94_v18, %v93_v15  ;;  %v206_v18 = vld [vmem:[#allocation5 + $0x118] sm:$0xff] }
  0x97   :  { %229 = vmatpush.msra.mxu2 %v208_v14  ;;  %v280_v14 = vld [vmem:[#allocation5 + $0x180] sm:$0xff] }
  0x98   :  { %v90_v23 = vadd.f32 %v89_v20, %v88_v17  ;;  %v96_v24 = vrot.slane %v95_v21, 1  ;;  %v207_v17 = vld [vmem:[#allocation5 + $0x120] sm:$0xff] }
  0x99   :  { %230 = vmatpush.msra.mxu2 %v207_v17 }
  0x9a   :  { %v97_v26 = vadd.f32 %v96_v24, %v95_v21  ;;  %v98_v27 = vmul.f32 0.125, %v90_v23  ;;  %v205_v21 = vld [vmem:[#allocation5 + $0x110] sm:$0xff]  ;;  %v204_v23 = vld [vmem:[#allocation5 + $0x108] sm:$0xff] }
  0x9b   :  { %231 = vmatpush.msra.mxu2 %v206_v18 }
  0x9c   :  { %v99_v30 = vmul.f32 0.125, %v97_v26  ;;  %v100_v31 = vmul.f32 %v98_v27, %v98_v27 }
  0x9d   :  { %232 = vmatpush.msra.mxu2 %v205_v21 }
  0x9e   :  { %v101_v33 = vsub.f32 %v99_v30, %v100_v31 }
  0x9f   :  { %233 = vmatpush.msra.mxu2 %v204_v23 }
  0xa0   :  { %v102_v35 = vmax.f32 %v101_v33, 0.0 }
  0xa1   :  { %234 = vmatpush.msra.mxu2 %v203_v25 }
  0xa2   :  { %v103_v37 = vadd.f32 1e-05, %v102_v35 }
  0xa4   :  { %343 = vrsqrt.f32 %v103_v37  ;;  %vm110_vm2 = vweird.f32 %v103_v37 }
  0xaa   :  { %v344_v38 = vpop.eup %343 }
  0xab   :  { %v105_v39 = vmul.f32 %v344_v38, %v103_v37  ;;  %vm111_vm1 = vweird.f32 %v344_v38 }
  0xac   :  { %vm112_vm3 = vmor %vm110_vm2, %vm111_vm1 }
  0xad   :  { %v106_v40 = vmul.f32 %v344_v38, %v105_v39 }
  0xaf   :  { %v107_v41 = vmul.f32 0.5, %v106_v40 }
  0xb1   :  { %v108_v42 = vsub.f32 1.5, %v107_v41 }
  0xb3   :  { %v109_v44 = vmul.f32 %v344_v38, %v108_v42 }
  0xb5   :  { %v113_v45 = vsel %vm112_vm3, %v344_v38, %v109_v44  ;;  %v295_v44 = vld [vmem:[#allocation5 + $0x1f8] sm:$0xff] }
  0xb6   :  { %v114_v46 = vmul.f32 %v113_v45, %v486_v43  ;;  %297 = vmatpush.msra.mxu3 %v295_v44  ;;  %v294_v45 = vld [vmem:[#allocation5 + $0x1f0] sm:$0xff] }
  0xb8   :  { %v115_v47 = vmul.f32 %v114_v46, %v98_v27  ;;  %v120_v48 = vperm.slane %v114_v46, 0  ;;  %298 = vmatpush.msra.mxu3 %v294_v45  ;;  %v293_v46 = vld [vmem:[#allocation5 + $0x1e8] sm:$0xff] }
  0xba   :  { %v117_v49 = vrot.slane %v115_v47, 7  ;;  %v121_v51 = vmul.f32 %v120_v48, %v82_v7  ;;  %299 = vmatpush.msra.mxu3 %v293_v46  ;;  %v292_v47 = vld [vmem:[#allocation5 + $0x1e0] sm:$0xff]  ;;  %v291_v48 = vld [vmem:[#allocation5 + $0x1d8] sm:$0xff] }
  0xbc   :  { %v119_v50 = vsub.f32 %v486_v43, %v117_v49  ;;  %300 = vmatpush.msra.mxu3 %v292_v47 }
  0xbe   :  { %v122_v52 = vperm.slane %v119_v50, 1  ;;  %301 = vmatpush.msra.mxu3 %v291_v48 }
  0xc0   :  { %v123_v53 = vadd.f32 %v122_v52, %v121_v51  ;;  %v290_v52 = vld [vmem:[#allocation5 + $0x1d0] sm:$0xff] }
  0xc1   :  { %302 = vmatpush.msra.mxu3 %v290_v52 }
  0xc2   :  { %v124_v54 = vmax.f32 %v123_v53, 0.0 }
  0xc3   :  { %303 = vmatpush.msra.mxu3 %v289_v55 }
  0xc4   :  { %158 = vmatmul.f32.vlgmr.msra.gmra.mxu1 %v124_v54 }
  0xc5   :  { %304 = vmatpush.msra.mxu3 %v288_v58 }
 0x141   :  { %v159_v60 = vpop.f32.mrf.mxu1 }
 0x142   :  { %v162_v61 = vrot.slane %v159_v60, 4  ;;  %v168_v62 = vmul.f32 %v159_v60, %v159_v60 }
 0x144   :  { %v163_v0 = vadd.f32 %v162_v61, %v159_v60  ;;  %v169_v1 = vrot.slane %v168_v62, 4  ;;  %v287_v61 = vld [vmem:[#allocation5 + $0x1b8] sm:$0xff] }
 0x145   :  { %305 = vmatpush.msra.mxu3 %v287_v61 }
 0x146   :  { %v164_v3 = vrot.slane %v163_v0, 2  ;;  %v170_v4 = vadd.f32 %v169_v1, %v168_v62 }
 0x148   :  { %v165_v6 = vadd.f32 %v164_v3, %v163_v0  ;;  %v171_v7 = vrot.slane %v170_v4, 2  ;;  %v286_v0 = vld [vmem:[#allocation5 + $0x1b0] sm:$0xff]  ;;  %v285_v3 = vld [vmem:[#allocation5 + $0x1a8] sm:$0xff] }
 0x149   :  { %306 = vmatpush.msra.mxu3 %v286_v0 }
 0x14a   :  { %v166_v9 = vrot.slane %v165_v6, 1  ;;  %v172_v10 = vadd.f32 %v171_v7, %v170_v4  ;;  %v283_v7 = vld [vmem:[#allocation5 + $0x198] sm:$0xff] }
 0x14b   :  { %307 = vmatpush.msra.mxu3 %v285_v3 }
 0x14c   :  { %v167_v12 = vadd.f32 %v166_v9, %v165_v6  ;;  %v173_v13 = vrot.slane %v172_v10, 1  ;;  %v284_v6 = vld [vmem:[#allocation5 + $0x1a0] sm:$0xff] }
 0x14d   :  { %308 = vmatpush.msra.mxu3 %v284_v6 }
 0x14e   :  { %v174_v15 = vadd.f32 %v173_v13, %v172_v10  ;;  %v175_v16 = vmul.f32 0.125, %v167_v12  ;;  %v282_v10 = vld [vmem:[#allocation5 + $0x190] sm:$0xff]  ;;  %v281_v12 = vld [vmem:[#allocation5 + $0x188] sm:$0xff] }
 0x14f   :  { %309 = vmatpush.msra.mxu3 %v283_v7 }
 0x150   :  { %v176_v19 = vmul.f32 0.125, %v174_v15  ;;  %v177_v20 = vmul.f32 %v175_v16, %v175_v16 }
 0x151   :  { %310 = vmatpush.msra.mxu3 %v282_v10 }
 0x152   :  { %v178_v22 = vsub.f32 %v176_v19, %v177_v20 }
 0x153   :  { %311 = vmatpush.msra.mxu3 %v281_v12 }
 0x154   :  { %v179_v24 = vmax.f32 %v178_v22, 0.0 }
 0x155   :  { %312 = vmatpush.msra.mxu3 %v280_v14 }
 0x156   :  { %v180_v26 = vadd.f32 1e-05, %v179_v24 }
 0x158   :  { %345 = vrsqrt.f32 %v180_v26  ;;  %vm187_vm5 = vweird.f32 %v180_v26 }
 0x15e   :  { %v346_v27 = vpop.eup %345 }
 0x15f   :  { %v182_v28 = vmul.f32 %v346_v27, %v180_v26  ;;  %vm188_vm4 = vweird.f32 %v346_v27 }
 0x160   :  { %vm189_vm6 = vmor %vm187_vm5, %vm188_vm4 }
 0x161   :  { %v183_v29 = vmul.f32 %v346_v27, %v182_v28 }
 0x163   :  { %v184_v30 = vmul.f32 0.5, %v183_v29 }
 0x165   :  { %v185_v31 = vsub.f32 1.5, %v184_v30 }
 0x167   :  { %v186_v32 = vmul.f32 %v346_v27, %v185_v31 }
 0x169   :  { %v190_v33 = vsel %vm189_vm6, %v346_v27, %v186_v32  ;;  %v296_v32 = vperm.slane %v486_v43, 6 }
 0x16a   :  { %v191_v34 = vmul.f32 %v190_v33, %v486_v43 }
 0x16c   :  { %v192_v35 = vmul.f32 %v191_v34, %v175_v16  ;;  %v197_v36 = vperm.slane %v191_v34, 2 }
 0x16e   :  { %v194_v37 = vrot.slane %v192_v35, 7  ;;  %v198_v39 = vmul.f32 %v197_v36, %v159_v60 }
 0x170   :  { %v196_v38 = vsub.f32 %v486_v43, %v194_v37 }
 0x172   :  { %v199_v40 = vperm.slane %v196_v38, 3 }
 0x174   :  { %v200_v41 = vadd.f32 %v199_v40, %v198_v39 }
 0x176   :  { %v201_v42 = vmax.f32 %v200_v41, 0.0 }
 0x178   :  { %235 = vmatmul.f32.vlgmr.msra.gmra.mxu2 %v201_v42 }
 0x1fb   :  { %v236_v49 = vpop.f32.mrf.mxu2 }
 0x1fc   :  { %v239_v50 = vrot.slane %v236_v49, 4  ;;  %v245_v51 = vmul.f32 %v236_v49, %v236_v49 }
 0x1fe   :  { %v240_v53 = vadd.f32 %v239_v50, %v236_v49  ;;  %v246_v54 = vrot.slane %v245_v51, 4 }
 0x200   :  { %v241_v56 = vrot.slane %v240_v53, 2  ;;  %v247_v57 = vadd.f32 %v246_v54, %v245_v51 }
 0x202   :  { %v242_v59 = vadd.f32 %v241_v56, %v240_v53  ;;  %v248_v60 = vrot.slane %v247_v57, 2 }
 0x204   :  { %v243_v62 = vrot.slane %v242_v59, 1  ;;  %v249_v63 = vadd.f32 %v248_v60, %v247_v57 }
 0x206   :  { %v244_v1 = vadd.f32 %v243_v62, %v242_v59  ;;  %v250_v2 = vrot.slane %v249_v63, 1 }
 0x208   :  { %v251_v4 = vadd.f32 %v250_v2, %v249_v63  ;;  %v252_v5 = vmul.f32 0.125, %v244_v1 }
 0x20a   :  { %v253_v8 = vmul.f32 0.125, %v251_v4  ;;  %v254_v9 = vmul.f32 %v252_v5, %v252_v5 }
 0x20c   :  { %v255_v11 = vsub.f32 %v253_v8, %v254_v9 }
 0x20e   :  { %v256_v13 = vmax.f32 %v255_v11, 0.0 }
 0x210   :  { %v257_v15 = vadd.f32 1e-05, %v256_v13 }
 0x212   :  { %347 = vrsqrt.f32 %v257_v15  ;;  %vm264_vm8 = vweird.f32 %v257_v15 }
 0x218   :  { %v348_v16 = vpop.eup %347 }
 0x219   :  { %v259_v17 = vmul.f32 %v348_v16, %v257_v15  ;;  %vm265_vm7 = vweird.f32 %v348_v16 }
 0x21a   :  { %vm266_vm9 = vmor %vm264_vm8, %vm265_vm7 }
 0x21b   :  { %v260_v18 = vmul.f32 %v348_v16, %v259_v17 }
 0x21d   :  { %v261_v19 = vmul.f32 0.5, %v260_v18 }
 0x21f   :  { %v262_v20 = vsub.f32 1.5, %v261_v19 }
 0x221   :  { %v263_v21 = vmul.f32 %v348_v16, %v262_v20 }
 0x223   :  { %v267_v22 = vsel %vm266_vm9, %v348_v16, %v263_v21 }
 0x224   :  { %v268_v23 = vmul.f32 %v267_v22, %v486_v43 }
 0x226   :  { %v269_v24 = vmul.f32 %v268_v23, %v252_v5  ;;  %v274_v25 = vperm.slane %v268_v23, 4 }
 0x228   :  { %v271_v26 = vrot.slane %v269_v24, 7  ;;  %v275_v28 = vmul.f32 %v274_v25, %v236_v49 }
 0x22a   :  { %v273_v27 = vsub.f32 %v486_v43, %v271_v26 }
 0x22c   :  { %v276_v29 = vperm.slane %v273_v27, 5 }
 0x22e   :  { %v277_v30 = vadd.f32 %v276_v29, %v275_v28 }
 0x230   :  { %v278_v31 = vmax.f32 %v277_v30, 0.0 }
 0x232   :  { %313 = vmatmul.f32.vlgmr.msra.gmra.mxu3 %v278_v31 }
 0x2b5   :  { %v314_v33 = vpop.f32.mrf.mxu3 }
 0x2b6   :  { %v315_v34 = vadd.f32 %v314_v33, %v296_v32 }
 0x2b8   :  { %317 = vst [vmem:[#allocation8] sm:$0xff] %v315_v34 }
 0x2b9   :  { %328 = dma.vmem_to_hbm [thread:$0]  %s324_s2, 128, %s326_s30, [#allocation4]  }
 0x2ba   :  { %449 = dma.done.wait [#allocation4], 128  }
 0x2bb   :  { %450 = vsyncadd [#allocation4], 4294967168 }
 0x2bc   :  { %333 = vsyncpa [#allocation3], 1 }
 0x2bd   :  { %334 = vsyncpa [#allocation6], 1 }
 0x2be   :  { %335 = vsyncpa [#allocation4], 1 }

</bundles_post_ra>
